<compile_context>
chip_gen: v7x
topology: tpu7x:2x2x1
jax: 0.10.0
libtpu: 0.0.40
codegen_flags: <defaults>
</compile_context>

<pallas_src>
import jax
import jax.numpy as jnp
from jax.experimental import pallas as pl
from jax.experimental.pallas import tpu as pltpu

INPUT_DIM = 1280
NUM_CLASSES = 10
LANES = 128


def dnn_line_kernel(x_ref, w_ref, b_ref, o_ref):
    # MXU matmul (bf16 or f32 inputs) with f32 accumulation.
    logits = jnp.dot(x_ref[...], w_ref[...],
                     preferred_element_type=jnp.float32)
    logits = logits + b_ref[...]          # bias; padded lanes carry -1e30
    # Numerically-stable log_softmax over the (lane-padded) class axis.
    m = jnp.max(logits, axis=1, keepdims=True)
    shifted = logits - m
    lse = jnp.log(jnp.sum(jnp.exp(shifted), axis=1, keepdims=True))
    o_ref[...] = (shifted - lse).astype(o_ref.dtype)


def dnn_line_forward(x, w_t, b, *, tb=512, matmul_dtype=jnp.bfloat16,
                     vmem_limit_bytes=32 * 1024 * 1024):
    """x: [B, D] f32, w_t: [D, C] f32 (transposed nn.Linear weight), b: [C] f32."""
    B, D = x.shape
    C = w_t.shape[1]
    c_pad = ((C + LANES - 1) // LANES) * LANES      # lane-dense class axis (128)

    # Batch tile: large for throughput, shrunk to the batch for tiny inputs,
    # rounded to a multiple of 16 (bf16 sublane packing).  For v7x, callers
    # with big B keep B // tb >= 2 so both TensorCores get grid steps.
    tb = int(min(tb, max(16, ((B + 15) // 16) * 16)))
    b_pad = ((B + tb - 1) // tb) * tb               # pad batch to a tile multiple

    # VMEM @ tb=512/bf16: 2x1.3 MiB x-bufs + 0.66 MiB weight + 0.5 MiB out
    # ~= 4 MiB, far under the 32 MiB limit on v5e/v6e/v7x.  Raise
    # vmem_limit_bytes if you push tb toward 2048+.
    x_p = x if b_pad == B else jnp.pad(x, ((0, b_pad - B), (0, 0)))
    x_p = x_p.astype(matmul_dtype)
    w_p = jnp.pad(w_t, ((0, 0), (0, c_pad - C))).astype(matmul_dtype)
    bias_p = jnp.pad(b.astype(jnp.float32).reshape(1, C),
                     ((0, 0), (0, c_pad - C)), constant_values=-1e30)

    out = pl.pallas_call(
        dnn_line_kernel,
        out_shape=jax.ShapeDtypeStruct((b_pad, c_pad), jnp.float32),
        grid_spec=pltpu.PrefetchScalarGridSpec(
            num_scalar_prefetch=0,
            grid=(b_pad // tb,),
            in_specs=[
                pl.BlockSpec((tb, D), lambda i: (i, 0)),       # x tile (streamed)
                pl.BlockSpec((D, c_pad), lambda i: (0, 0)),    # full weight (constant index)
                pl.BlockSpec((1, c_pad), lambda i: (0, 0)),    # bias (constant index)
            ],
            out_specs=pl.BlockSpec((tb, c_pad), lambda i: (i, 0)),
        ),
        compiler_params=pltpu.CompilerParams(
            dimension_semantics=("parallel",),
            vmem_limit_bytes=vmem_limit_bytes,
        ),
    )(x_p, w_p, bias_p)
    return out[:B, :C]


def init_params(key, input_dim, num_classes):
    # Mimic PyTorch nn.Linear default init: U(-1/sqrt(in), 1/sqrt(in))
    kw, kb = jax.random.split(key)
    bound = 1.0 / jnp.sqrt(jnp.float32(input_dim))
    w = jax.random.uniform(kw, (num_classes, input_dim), jnp.float32,
                           minval=-bound, maxval=bound)   # (out, in) as in torch
    b = jax.random.uniform(kb, (num_classes,), jnp.float32,
                           minval=-bound, maxval=bound)
    return w, b


if __name__ == "__main__":
    key = jax.random.PRNGKey(0)
    kx, kp = jax.random.split(key)

    B = 16
    x = jax.random.normal(kx, (B, INPUT_DIM), jnp.float32)
    w, b = init_params(kp, INPUT_DIM, NUM_CLASSES)
    w_t = w.T  # [D, C] for the kernel

    # Plain-JAX reference.
    ref = jax.nn.log_softmax(x @ w.T + b, axis=1)

    # Exact (f32-matmul) path — tight tolerance.
    out_f32 = jax.block_until_ready(
        dnn_line_forward(x, w_t, b, matmul_dtype=jnp.float32))
    assert out_f32.shape == (B, NUM_CLASSES)
    assert jnp.allclose(out_f32, ref, atol=1e-5, rtol=1e-5), "f32 mismatch vs reference"

    # Optimized (bf16 matmul inputs, f32 accumulation) path — looser tolerance
    # to absorb input quantization.
    out_bf16 = jax.block_until_ready(dnn_line_forward(x, w_t, b))
    assert out_bf16.shape == (B, NUM_CLASSES)
    assert jnp.allclose(out_bf16, ref, atol=2e-2, rtol=2e-2), "bf16 mismatch vs reference"

    print("KERNEL_OK")
</pallas_src>

<mosaic_0001>
module attributes {stable_mosaic.version = 11 : i64} {
  func.func @dnn_line_kernel(%arg0: i32, %arg1: memref<16x1280xf32, #tpu.memory_space<vmem>>, %arg2: memref<1280x128xf32, #tpu.memory_space<vmem>>, %arg3: memref<1x128xf32, #tpu.memory_space<vmem>>, %arg4: memref<16x128xf32, #tpu.memory_space<vmem>>) attributes {dimension_semantics = [#tpu.dimension_semantics<parallel>], iteration_bounds = array<i64: 1>, scalar_prefetch = 0 : i64, scratch_operands = 0 : i64, tpu.core_type = #tpu.core_type<tc>, window_params = [{transform_indices = @transform_0, window_bounds = array<i64: 16, 1280>}, {pipeline_mode = #tpu.pipeline_mode<synchronous>, transform_indices = @transform_1, window_bounds = array<i64: 1280, 128>}, {pipeline_mode = #tpu.pipeline_mode<synchronous>, transform_indices = @transform_2, window_bounds = array<i64: 1, 128>}, {transform_indices = @transform_3, window_bounds = array<i64: 16, 128>}]} {
    %c0 = arith.constant 0 : index
    %c0_0 = arith.constant 0 : index
    %0 = vector.load %arg1[%c0, %c0_0] : memref<16x1280xf32, #tpu.memory_space<vmem>>, vector<16x1280xf32>
    %c0_1 = arith.constant 0 : index
    %c0_2 = arith.constant 0 : index
    %1 = vector.load %arg2[%c0_1, %c0_2] : memref<1280x128xf32, #tpu.memory_space<vmem>>, vector<1280x128xf32>
    %cst = arith.constant dense<0.000000e+00> : vector<16x128xf32>
    %2 = tpu.matmul %0, %1, %cst {dimension_numbers = #tpu.dot_dimension_numbers<[1], [0], [0], [1], [0, 0, 1, 1], [], []>} : vector<16x1280xf32>, vector<1280x128xf32>, vector<16x128xf32> -> vector<16x128xf32>
    %c0_3 = arith.constant 0 : index
    %c0_4 = arith.constant 0 : index
    %3 = vector.load %arg3[%c0_3, %c0_4] : memref<1x128xf32, #tpu.memory_space<vmem>>, vector<1x128xf32>
    %4 = vector.broadcast %3 : vector<1x128xf32> to vector<16x128xf32>
    %5 = arith.addf %2, %4 : vector<16x128xf32>
    %cst_5 = arith.constant dense<0xFF800000> : vector<16xf32>
    %6 = vector.multi_reduction <maximumf>, %5, %cst_5 [1] : vector<16x128xf32> to vector<16xf32>
    %7 = vector.shape_cast %6 : vector<16xf32> to vector<16x1xf32>
    %8 = vector.broadcast %7 : vector<16x1xf32> to vector<16x128xf32>
    %9 = arith.subf %5, %8 : vector<16x128xf32>
    %10 = math.exp %9 : vector<16x128xf32>
    %cst_6 = arith.constant dense<0.000000e+00> : vector<16xf32>
    %11 = vector.multi_reduction <add>, %10, %cst_6 [1] : vector<16x128xf32> to vector<16xf32>
    %12 = vector.shape_cast %11 : vector<16xf32> to vector<16x1xf32>
    %13 = math.log %12 : vector<16x1xf32>
    %14 = vector.broadcast %13 : vector<16x1xf32> to vector<16x128xf32>
    %15 = arith.subf %9, %14 : vector<16x128xf32>
    %c0_7 = arith.constant 0 : index
    %c0_8 = arith.constant 0 : index
    %16 = vector.load %arg4[%c0_7, %c0_8] : memref<16x128xf32, #tpu.memory_space<vmem>>, vector<16x128xf32>
    tpu.vector_store %arg4[%c0_7, %c0_8], %15 {strides = array<i32>} : memref<16x128xf32, #tpu.memory_space<vmem>>, vector<16x128xf32>,
    return
  }
  func.func @transform_0(%arg0: i32) -> (i32, i32) {
    %c0_i32 = arith.constant 0 : i32
    %c0_i32_0 = arith.constant 0 : i32
    return %arg0, %c0_i32 : i32, i32
  }
  func.func @transform_1(%arg0: i32) -> (i32, i32) {
    %c0_i32 = arith.constant 0 : i32
    %c0_i32_0 = arith.constant 0 : i32
    %c0_i32_1 = arith.constant 0 : i32
    return %c0_i32, %c0_i32_0 : i32, i32
  }
  func.func @transform_2(%arg0: i32) -> (i32, i32) {
    %c0_i32 = arith.constant 0 : i32
    %c0_i32_0 = arith.constant 0 : i32
    %c0_i32_1 = arith.constant 0 : i32
    return %c0_i32, %c0_i32_0 : i32, i32
  }
  func.func @transform_3(%arg0: i32) -> (i32, i32) {
    %c0_i32 = arith.constant 0 : i32
    %c0_i32_0 = arith.constant 0 : i32
    return %arg0, %c0_i32 : i32, i32
  }
}

</mosaic_0001>

<bundles_post_ra>
// kernel: tpu_custom_call.1
= control target key start
LH: loop header
LB: loop body
LE: loop exit
PB: predicated region body
PF: predicated region fallthrough
CT: control target
= control target key end

     0   :  { %8 = vsyncpa [#allocation3], 0  ;;  %s1171_s0 = inlined_call_operand.hbm [shape: f32[16,1280], index: 0, kind: input, shape index: {}]   ;;  %s1172_s1 = inlined_call_operand.hbm [shape: f32[1280,128], index: 1, kind: input, shape index: {}]   ;;  %s1173_s2 = inlined_call_operand.vmem [shape: f32[1,128], index: 2, kind: input, shape index: {}]   ;;  %s1174_s3 = inlined_call_operand.hbm [shape: f32[16,128], index: 3, kind: output, shape index: {}]  }
   0x1   :  { %9 = vsyncpa [#allocation6], 0 }
   0x2   :  { %10 = vsyncpa [#allocation4], 0  ;;  %s1099_s12 = smov [#allocation2]   ;;  %s1027_s16 = scalar_lea.hbm %s1171_s0, 2560 }
   0x3   :  { %s16_s13 = sshll.u32 %s1099_s12, 4  ;;  %p1028_p0 = scmp.ne.s32.totalorder %s1171_s0, %s1027_s16  ;;  %s17_s13 = int_to_ptr.vmem [resolvable:$true] %s16_s13 }
   0x4   :  { %p1031_p1 = scmp.lt.u32.totalorder %s1027_s16, %s1171_s0 }
   0x6   :  { %p1033_p2 = pnand %p1031_p1, %p1028_p0 }
   0x8   :  { %1036 = shalt.err (!%p1033_p2)
}
   0x9   :  { %s1037_s21 = scalar_lea.vmem %s17_s13, 2560  ;;  %p1042_p4 = scmp.lt.s32.totalorder %s17_s13, %s17_s13 }
   0xa   :  { %p1038_p3 = scmp.ne.s32.totalorder %s17_s13, %s1037_s21  ;;  %p1043_p5 = scmp.lt.s32.totalorder %s1037_s21, %s1037_s21 }
   0xc   :  { %p1044_p6 = por %p1043_p5, %p1042_p4 }
   0xe   :  { %p1045_p7 = pnand %p1044_p6, %p1038_p3 }
  0x10   :  { %1048 = shalt.err (!%p1045_p7)
}
  0x11   :  { %s1100_s22 = smov 1280   ;;  %s1101_s23 = smov 80  }
  0x12   :  { %22 = dma.hbm_to_vmem [thread:$0]  %s1171_s0, 2560, %s17_s13, [#allocation3], %s1100_s22, %s1100_s22, %s1101_s23  }
  0x13   :  { %s1102_s26 = smov [#allocation5]   ;;  %s1049_s30 = scalar_lea.hbm %s1172_s1, 20480 }
  0x14   :  { %s28_s27 = sshll.u32 %s1102_s26, 4  ;;  %p1050_p8 = scmp.ne.s32.totalorder %s1172_s1, %s1049_s30  ;;  %s29_s27 = int_to_ptr.vmem [resolvable:$true] %s28_s27 }
  0x15   :  { %p1053_p9 = scmp.lt.u32.totalorder %s1049_s30, %s1172_s1 }
  0x17   :  { %p1055_p10 = pnand %p1053_p9, %p1050_p8 }
  0x19   :  { %1058 = shalt.err (!%p1055_p10)
}
  0x1a   :  { %s1059_s8 = scalar_lea.vmem %s29_s27, 20480  ;;  %p1064_p12 = scmp.lt.s32.totalorder %s29_s27, %s29_s27 }
  0x1b   :  { %p1060_p11 = scmp.ne.s32.totalorder %s29_s27, %s1059_s8  ;;  %p1065_p13 = scmp.lt.s32.totalorder %s1059_s8, %s1059_s8 }
  0x1d   :  { %p1066_p0 = por %p1065_p13, %p1064_p12 }
  0x1f   :  { %p1067_p1 = pnand %p1066_p0, %p1060_p11 }
  0x21   :  { %1070 = shalt.err (!%p1067_p1)
}
  0x22   :  { %s1103_s0 = smov 128   ;;  %s1104_s9 = smov 8  }
  0x23   :  { %34 = dma.hbm_to_vmem [thread:$0]  %s1172_s1, 20480, %s29_s27, [#allocation6], %s1103_s0, %s1103_s0, %s1104_s9  }
  0x24   :  { %1093 = dma.done.wait [#allocation3], 2560  }
  0x25   :  { %1094 = vsyncadd [#allocation3], 4294964736 }
  0x26   :  { %1095 = dma.done.wait [#allocation6], 20480  }
  0x27   :  { %1096 = vsyncadd [#allocation6], 4294946816  ;;  %v79_v0 = vld [vmem:[#allocation5 + $0x80] sm:$0xff]  ;;  %v80_v1 = vld [vmem:[#allocation5 + $0x88] sm:$0xff] }
  0x28   :  { %v111_v2 = vld [vmem:[#allocation5 + $0x180] sm:$0xff]  ;;  %v836_v3 = vpack.c.bf16 %v80_v1, %v79_v0  ;;  %v112_v4 = vld [vmem:[#allocation5 + $0x188] sm:$0xff]  ;;  %v81_v11 = vld [vmem:[#allocation5 + $0x90] sm:$0xff] }
  0x29   :  { %v63_v5 = vld [vmem:[#allocation5] sm:$0xff]  ;;  %v64_v6 = vld [vmem:[#allocation5 + $0x8] sm:$0xff]  ;;  %v868_v7 = vpack.c.bf16 %v112_v4, %v111_v2  ;;  %v82_v13 = vld [vmem:[#allocation5 + $0x98] sm:$0xff] }
  0x2a   :  { %v838_v8 = vpack.c.bf16 %v64_v6, %v63_v5  ;;  %v95_v9 = vld [vmem:[#allocation5 + $0x100] sm:$0xff]  ;;  %v96_v10 = vld [vmem:[#allocation5 + $0x108] sm:$0xff]  ;;  %837 = vmatprep.subr.bf16.mxu0 %v836_v3  ;;  %v113_v14 = vld [vmem:[#allocation5 + $0x190] sm:$0xff]  ;;  %v840_v16 = vpack.c.bf16 %v82_v13, %v81_v11 }
  0x2b   :  { %v870_v12 = vpack.c.bf16 %v96_v10, %v95_v9  ;;  %v114_v15 = vld [vmem:[#allocation5 + $0x198] sm:$0xff]  ;;  %869 = vmatprep.subr.bf16.mxu1 %v868_v7  ;;  %v65_v18 = vld [vmem:[#allocation5 + $0x10] sm:$0xff]  ;;  %v83_v23 = vld [vmem:[#allocation5 + $0xa0] sm:$0xff] }
  0x2c   :  { %839 = vmatpush3.bf16.msra.mxu0 %v838_v8  ;;  %v872_v17 = vpack.c.bf16 %v114_v15, %v113_v14  ;;  %v66_v19 = vld [vmem:[#allocation5 + $0x18] sm:$0xff]  ;;  %v97_v20 = vld [vmem:[#allocation5 + $0x110] sm:$0xff]  ;;  %v84_v24 = vld [vmem:[#allocation5 + $0xa8] sm:$0xff] }
  0x2d   :  { %871 = vmatpush3.bf16.msra.mxu1 %v870_v12  ;;  %v842_v21 = vpack.c.bf16 %v66_v19, %v65_v18  ;;  %v98_v22 = vld [vmem:[#allocation5 + $0x118] sm:$0xff]  ;;  %841 = vmatprep.subr.bf16.mxu0 %v840_v16  ;;  %v844_v26 = vpack.c.bf16 %v84_v24, %v83_v23  ;;  %v115_v27 = vld [vmem:[#allocation5 + $0x1a0] sm:$0xff]  ;;  %v116_v28 = vld [vmem:[#allocation5 + $0x1a8] sm:$0xff] }
  0x2e   :  { %873 = vmatprep.subr.bf16.mxu1 %v872_v17  ;;  %v874_v25 = vpack.c.bf16 %v98_v22, %v97_v20  ;;  %v67_v29 = vld [vmem:[#allocation5 + $0x20] sm:$0xff]  ;;  %v876_v30 = vpack.c.bf16 %v116_v28, %v115_v27  ;;  %v68_v31 = vld [vmem:[#allocation5 + $0x28] sm:$0xff]  ;;  %v85_v35 = vld [vmem:[#allocation5 + $0xb0] sm:$0xff] }
  0x2f   :  { %v99_v32 = vld [vmem:[#allocation5 + $0x120] sm:$0xff]  ;;  %v100_v33 = vld [vmem:[#allocation5 + $0x128] sm:$0xff]  ;;  %v846_v34 = vpack.c.bf16 %v68_v31, %v67_v29  ;;  %v86_v36 = vld [vmem:[#allocation5 + $0xb8] sm:$0xff] }
  0x30   :  { %843 = vmatpush3.bf16.msra.mxu0 %v842_v21  ;;  %v117_v37 = vld [vmem:[#allocation5 + $0x1b0] sm:$0xff]  ;;  %v878_v38 = vpack.c.bf16 %v100_v33, %v99_v32  ;;  %v848_v39 = vpack.c.bf16 %v86_v36, %v85_v35  ;;  %v118_v40 = vld [vmem:[#allocation5 + $0x1b8] sm:$0xff]  ;;  %v87_v46 = vld [vmem:[#allocation5 + $0xc0] sm:$0xff] }
  0x31   :  { %875 = vmatpush3.bf16.msra.mxu1 %v874_v25  ;;  %845 = vmatprep.subr.bf16.mxu0 %v844_v26  ;;  %v69_v41 = vld [vmem:[#allocation5 + $0x30] sm:$0xff]  ;;  %v70_v42 = vld [vmem:[#allocation5 + $0x38] sm:$0xff]  ;;  %v880_v43 = vpack.c.bf16 %v118_v40, %v117_v37  ;;  %v88_v47 = vld [vmem:[#allocation5 + $0xc8] sm:$0xff] }
  0x32   :  { %877 = vmatprep.subr.bf16.mxu1 %v876_v30  ;;  %v101_v44 = vld [vmem:[#allocation5 + $0x130] sm:$0xff]  ;;  %v102_v45 = vld [vmem:[#allocation5 + $0x138] sm:$0xff]  ;;  %v119_v48 = vld [vmem:[#allocation5 + $0x1c0] sm:$0xff]  ;;  %v850_v50 = vpack.c.bf16 %v70_v42, %v69_v41  ;;  %v852_v52 = vpack.c.bf16 %v88_v47, %v87_v46 }
  0x33   :  { %v120_v49 = vld [vmem:[#allocation5 + $0x1c8] sm:$0xff]  ;;  %v882_v51 = vpack.c.bf16 %v102_v45, %v101_v44  ;;  %v71_v53 = vld [vmem:[#allocation5 + $0x40] sm:$0xff]  ;;  %v89_v58 = vld [vmem:[#allocation5 + $0xd0] sm:$0xff] }
  0x34   :  { %847 = vmatpush3.bf16.msra.mxu0 %v846_v34  ;;  %v72_v54 = vld [vmem:[#allocation5 + $0x48] sm:$0xff]  ;;  %v103_v55 = vld [vmem:[#allocation5 + $0x140] sm:$0xff]  ;;  %v884_v56 = vpack.c.bf16 %v120_v49, %v119_v48  ;;  %v90_v59 = vld [vmem:[#allocation5 + $0xd8] sm:$0xff] }
  0x35   :  { %879 = vmatpush3.bf16.msra.mxu1 %v878_v38  ;;  %849 = vmatprep.subr.bf16.mxu0 %v848_v39  ;;  %v104_v57 = vld [vmem:[#allocation5 + $0x148] sm:$0xff]  ;;  %v121_v60 = vld [vmem:[#allocation5 + $0x1d0] sm:$0xff]  ;;  %v122_v61 = vld [vmem:[#allocation5 + $0x1d8] sm:$0xff]  ;;  %v854_v62 = vpack.c.bf16 %v72_v54, %v71_v53  ;;  %v856_v0 = vpack.c.bf16 %v90_v59, %v89_v58 }
  0x36   :  { %881 = vmatprep.subr.bf16.mxu1 %v880_v43  ;;  %v886_v63 = vpack.c.bf16 %v104_v57, %v103_v55  ;;  %v73_v1 = vld [vmem:[#allocation5 + $0x50] sm:$0xff]  ;;  %v74_v2 = vld [vmem:[#allocation5 + $0x58] sm:$0xff]  ;;  %v888_v4 = vpack.c.bf16 %v122_v61, %v121_v60  ;;  %v91_v6 = vld [vmem:[#allocation5 + $0xe0] sm:$0xff] }
  0x37   :  { %v105_v3 = vld [vmem:[#allocation5 + $0x150] sm:$0xff]  ;;  %v106_v5 = vld [vmem:[#allocation5 + $0x158] sm:$0xff]  ;;  %v92_v7 = vld [vmem:[#allocation5 + $0xe8] sm:$0xff]  ;;  %v858_v10 = vpack.c.bf16 %v74_v2, %v73_v1 }
  0x38   :  { %851 = vmatpush3.bf16.msra.mxu0 %v850_v50  ;;  %v123_v8 = vld [vmem:[#allocation5 + $0x1e0] sm:$0xff]  ;;  %v124_v9 = vld [vmem:[#allocation5 + $0x1e8] sm:$0xff]  ;;  %v890_v13 = vpack.c.bf16 %v106_v5, %v105_v3  ;;  %v860_v14 = vpack.c.bf16 %v92_v7, %v91_v6  ;;  %v93_v19 = vld [vmem:[#allocation5 + $0xf0] sm:$0xff] }
  0x39   :  { %883 = vmatpush3.bf16.msra.mxu1 %v882_v51  ;;  %853 = vmatprep.subr.bf16.mxu0 %v852_v52  ;;  %v75_v11 = vld [vmem:[#allocation5 + $0x60] sm:$0xff]  ;;  %v76_v12 = vld [vmem:[#allocation5 + $0x68] sm:$0xff]  ;;  %v892_v18 = vpack.c.bf16 %v124_v9, %v123_v8  ;;  %v94_v20 = vld [vmem:[#allocation5 + $0xf8] sm:$0xff] }
  0x3a   :  { %885 = vmatprep.subr.bf16.mxu1 %v884_v56  ;;  %v107_v15 = vld [vmem:[#allocation5 + $0x160] sm:$0xff]  ;;  %v108_v16 = vld [vmem:[#allocation5 + $0x168] sm:$0xff]  ;;  %v46_v21 = vld [vmem:[#allocation2 + $0x18] sm:$0xff]  ;;  %v862_v24 = vpack.c.bf16 %v76_v12, %v75_v11  ;;  %v864_v26 = vpack.c.bf16 %v94_v20, %v93_v19 }
  0x3b   :  { %v44_v17 = vld [vmem:[#allocation2 + $0x8] sm:$0xff]  ;;  %v125_v22 = vld [vmem:[#allocation5 + $0x1f0] sm:$0xff]  ;;  %v126_v23 = vld [vmem:[#allocation5 + $0x1f8] sm:$0xff]  ;;  %369 = vmatprep.mubr.f32.mxu1 %v46_v21  ;;  %v894_v25 = vpack.c.bf16 %v108_v16, %v107_v15 }
  0x3c   :  { %855 = vmatpush3.bf16.msra.mxu0 %v854_v62  ;;  %294 = vmatprep.mubr.f32.mxu0 %v44_v17  ;;  %v77_v27 = vld [vmem:[#allocation5 + $0x70] sm:$0xff]  ;;  %v78_v28 = vld [vmem:[#allocation5 + $0x78] sm:$0xff]  ;;  %v896_v30 = vpack.c.bf16 %v126_v23, %v125_v22  ;;  %v143_v32 = vld [vmem:[#allocation5 + $0x280] sm:$0xff] }
  0x3d   :  { %887 = vmatpush3.bf16.msra.mxu1 %v886_v63  ;;  %857 = vmatprep.subr.bf16.mxu0 %v856_v0  ;;  %v109_v29 = vld [vmem:[#allocation5 + $0x170] sm:$0xff]  ;;  %v110_v31 = vld [vmem:[#allocation5 + $0x178] sm:$0xff]  ;;  %v144_v33 = vld [vmem:[#allocation5 + $0x288] sm:$0xff]  ;;  %v866_v36 = vpack.c.bf16 %v78_v28, %v77_v27 }
  0x3e   :  { %889 = vmatprep.subr.bf16.mxu1 %v888_v4  ;;  %v175_v34 = vld [vmem:[#allocation5 + $0x380] sm:$0xff]  ;;  %v176_v35 = vld [vmem:[#allocation5 + $0x388] sm:$0xff]  ;;  %v898_v37 = vpack.c.bf16 %v110_v31, %v109_v29  ;;  %v900_v38 = vpack.c.bf16 %v144_v33, %v143_v32  ;;  %v145_v44 = vld [vmem:[#allocation5 + $0x290] sm:$0xff] }
  0x3f   :  { %v127_v39 = vld [vmem:[#allocation5 + $0x200] sm:$0xff]  ;;  %v128_v40 = vld [vmem:[#allocation5 + $0x208] sm:$0xff]  ;;  %v932_v42 = vpack.c.bf16 %v176_v35, %v175_v34  ;;  %v146_v45 = vld [vmem:[#allocation5 + $0x298] sm:$0xff] }
  0x40   :  { %859 = vmatpush3.bf16.msra.mxu0 %v858_v10  ;;  %v159_v41 = vld [vmem:[#allocation5 + $0x300] sm:$0xff]  ;;  %v160_v43 = vld [vmem:[#allocation5 + $0x308] sm:$0xff]  ;;  %v177_v46 = vld [vmem:[#allocation5 + $0x390] sm:$0xff]  ;;  %v902_v50 = vpack.c.bf16 %v128_v40, %v127_v39  ;;  %v904_v52 = vpack.c.bf16 %v146_v45, %v145_v44 }
  0x41   :  { %891 = vmatpush3.bf16.msra.mxu1 %v890_v13  ;;  %861 = vmatprep.subr.bf16.mxu0 %v860_v14  ;;  %v178_v47 = vld [vmem:[#allocation5 + $0x398] sm:$0xff]  ;;  %v43_v48 = vld [vmem:[#allocation2] sm:$0xff]  ;;  %v45_v49 = vld [vmem:[#allocation2 + $0x10] sm:$0xff]  ;;  %v934_v51 = vpack.c.bf16 %v160_v43, %v159_v41 }
  0x42   :  { %893 = vmatprep.subr.bf16.mxu1 %v892_v18  ;;  %v129_v53 = vld [vmem:[#allocation5 + $0x210] sm:$0xff]  ;;  %v130_v54 = vld [vmem:[#allocation5 + $0x218] sm:$0xff]  ;;  %v936_v56 = vpack.c.bf16 %v178_v47, %v177_v46  ;;  %v147_v58 = vld [vmem:[#allocation5 + $0x2a0] sm:$0xff] }
  0x43   :  { %v161_v55 = vld [vmem:[#allocation5 + $0x310] sm:$0xff]  ;;  %v162_v57 = vld [vmem:[#allocation5 + $0x318] sm:$0xff]  ;;  %v148_v59 = vld [vmem:[#allocation5 + $0x2a8] sm:$0xff]  ;;  %v906_v62 = vpack.c.bf16 %v130_v54, %v129_v53 }
  0x44   :  { %863 = vmatpush3.bf16.msra.mxu0 %v862_v24  ;;  %v179_v60 = vld [vmem:[#allocation5 + $0x3a0] sm:$0xff]  ;;  %v180_v61 = vld [vmem:[#allocation5 + $0x3a8] sm:$0xff]  ;;  %v938_v63 = vpack.c.bf16 %v162_v57, %v161_v55  ;;  %v908_v0 = vpack.c.bf16 %v148_v59, %v147_v58  ;;  %v149_v6 = vld [vmem:[#allocation5 + $0x2b0] sm:$0xff] }
  0x45   :  { %895 = vmatpush3.bf16.msra.mxu1 %v894_v25  ;;  %865 = vmatprep.subr.bf16.mxu0 %v864_v26  ;;  %v131_v1 = vld [vmem:[#allocation5 + $0x220] sm:$0xff]  ;;  %v132_v2 = vld [vmem:[#allocation5 + $0x228] sm:$0xff]  ;;  %v940_v4 = vpack.c.bf16 %v180_v61, %v179_v60  ;;  %v150_v7 = vld [vmem:[#allocation5 + $0x2b8] sm:$0xff] }
  0x46   :  { %897 = vmatprep.subr.bf16.mxu1 %v896_v30  ;;  %v163_v3 = vld [vmem:[#allocation5 + $0x320] sm:$0xff]  ;;  %v164_v5 = vld [vmem:[#allocation5 + $0x328] sm:$0xff]  ;;  %v181_v8 = vld [vmem:[#allocation5 + $0x3b0] sm:$0xff]  ;;  %v910_v10 = vpack.c.bf16 %v132_v2, %v131_v1  ;;  %v912_v15 = vpack.c.bf16 %v150_v7, %v149_v6 }
  0x47   :  { %v182_v9 = vld [vmem:[#allocation5 + $0x3b8] sm:$0xff]  ;;  %v133_v11 = vld [vmem:[#allocation5 + $0x230] sm:$0xff]  ;;  %v942_v14 = vpack.c.bf16 %v164_v5, %v163_v3  ;;  %v151_v20 = vld [vmem:[#allocation5 + $0x2c0] sm:$0xff] }
  0x48   :  { %867 = vmatpush3.bf16.msra.mxu0 %v866_v36  ;;  %v134_v12 = vld [vmem:[#allocation5 + $0x238] sm:$0xff]  ;;  %v165_v13 = vld [vmem:[#allocation5 + $0x330] sm:$0xff]  ;;  %v944_v19 = vpack.c.bf16 %v182_v9, %v181_v8  ;;  %v152_v21 = vld [vmem:[#allocation5 + $0x2c8] sm:$0xff] }
  0x49   :  { %899 = vmatpush3.bf16.msra.mxu1 %v898_v37  ;;  %901 = vmatprep.subr.bf16.mxu0 %v900_v38  ;;  %v166_v16 = vld [vmem:[#allocation5 + $0x338] sm:$0xff]  ;;  %v53_v18 = vld [vmem:[#allocation2 + $0x50] sm:$0xff]  ;;  %v56_v22 = vld [vmem:[#allocation2 + $0x68] sm:$0xff]  ;;  %v914_v26 = vpack.c.bf16 %v134_v12, %v133_v11  ;;  %v916_v30 = vpack.c.bf16 %v152_v21, %v151_v20 }
  0x4a   :  { %933 = vmatprep.subr.bf16.mxu1 %v932_v42  ;;  %v54_v17 = vld [vmem:[#allocation2 + $0x58] sm:$0xff]  ;;  %v183_v23 = vld [vmem:[#allocation5 + $0x3c0] sm:$0xff]  ;;  %v184_v24 = vld [vmem:[#allocation5 + $0x3c8] sm:$0xff]  ;;  %v946_v29 = vpack.c.bf16 %v166_v16, %v165_v13 }
  0x4b   :  { %295 = vmatmul.mubr.f32.vlgmr.msra.gmra.mrb[0].mxu0 %v43_v48  ;;  %v55_v25 = vld [vmem:[#allocation2 + $0x60] sm:$0xff]  ;;  %v136_v28 = vld [vmem:[#allocation5 + $0x248] sm:$0xff]  ;;  %v948_v34 = vpack.c.bf16 %v184_v24, %v183_v23  ;;  %v153_v35 = vld [vmem:[#allocation5 + $0x2d0] sm:$0xff] }
  0x4c   :  { %370 = vmatmul.mubr.f32.vlgmr.msra.gmra.mrb[0].mxu1 %v45_v49  ;;  %903 = vmatpush3.bf16.msra.mxu0 %v902_v50  ;;  %v135_v27 = vld [vmem:[#allocation5 + $0x240] sm:$0xff]  ;;  %v168_v32 = vld [vmem:[#allocation5 + $0x348] sm:$0xff]  ;;  %v154_v36 = vld [vmem:[#allocation5 + $0x2d8] sm:$0xff] }
  0x4d   :  { %935 = vmatpush3.bf16.msra.mxu1 %v934_v51  ;;  %905 = vmatprep.subr.bf16.mxu0 %v904_v52  ;;  %v167_v31 = vld [vmem:[#allocation5 + $0x340] sm:$0xff]  ;;  %v48_v33 = vld [vmem:[#allocation2 + $0x28] sm:$0xff]  ;;  %v50_v37 = vld [vmem:[#allocation2 + $0x38] sm:$0xff]  ;;  %v918_v40 = vpack.c.bf16 %v136_v28, %v135_v27  ;;  %v920_v42 = vpack.c.bf16 %v154_v36, %v153_v35 }
  0x4e   :  { %937 = vmatprep.subr.bf16.mxu1 %v936_v56  ;;  %299 = vmatprep.mubr.f32.mxu0 %v54_v17  ;;  %v185_v38 = vld [vmem:[#allocation5 + $0x3d0] sm:$0xff]  ;;  %v186_v39 = vld [vmem:[#allocation5 + $0x3d8] sm:$0xff]  ;;  %v950_v41 = vpack.c.bf16 %v168_v32, %v167_v31  ;;  %v155_v48 = vld [vmem:[#allocation5 + $0x2e0] sm:$0xff] }
  0x4f   :  { %300 = vmatmul.mubr.f32.gmra.mrb[2].mxu0 %v53_v18  ;;  %374 = vmatprep.mubr.f32.mxu1 %v56_v22  ;;  %v137_v43 = vld [vmem:[#allocation5 + $0x250] sm:$0xff]  ;;  %v138_v44 = vld [vmem:[#allocation5 + $0x258] sm:$0xff]  ;;  %v952_v46 = vpack.c.bf16 %v186_v39, %v185_v38  ;;  %v156_v49 = vld [vmem:[#allocation5 + $0x2e8] sm:$0xff] }
  0x50   :  { %907 = vmatpush3.bf16.msra.mxu0 %v906_v62  ;;  %375 = vmatmul.mubr.f32.gmra.mrb[2].mxu1 %v55_v25  ;;  %v169_v45 = vld [vmem:[#allocation5 + $0x350] sm:$0xff]  ;;  %v170_v47 = vld [vmem:[#allocation5 + $0x358] sm:$0xff]  ;;  %v187_v50 = vld [vmem:[#allocation5 + $0x3e0] sm:$0xff]  ;;  %v922_v52 = vpack.c.bf16 %v138_v44, %v137_v43  ;;  %v924_v54 = vpack.c.bf16 %v156_v49, %v155_v48 }
  0x51   :  { %939 = vmatpush3.bf16.msra.mxu1 %v938_v63  ;;  %909 = vmatprep.subr.bf16.mxu0 %v908_v0  ;;  %v188_v51 = vld [vmem:[#allocation5 + $0x3e8] sm:$0xff]  ;;  %v954_v53 = vpack.c.bf16 %v170_v47, %v169_v45  ;;  %v139_v55 = vld [vmem:[#allocation5 + $0x260] sm:$0xff]  ;;  %v157_v60 = vld [vmem:[#allocation5 + $0x2f0] sm:$0xff] }
  0x52   :  { %941 = vmatprep.subr.bf16.mxu1 %v940_v4  ;;  %444 = vmatprep.mubr.f32.mxu0 %v48_v33  ;;  %v140_v56 = vld [vmem:[#allocation5 + $0x268] sm:$0xff]  ;;  %v171_v57 = vld [vmem:[#allocation5 + $0x360] sm:$0xff]  ;;  %v956_v58 = vpack.c.bf16 %v188_v51, %v187_v50  ;;  %v158_v61 = vld [vmem:[#allocation5 + $0x2f8] sm:$0xff] }
  0x53   :  { %519 = vmatprep.mubr.f32.mxu1 %v50_v37  ;;  %v172_v59 = vld [vmem:[#allocation5 + $0x368] sm:$0xff]  ;;  %v189_v62 = vld [vmem:[#allocation5 + $0x3f0] sm:$0xff]  ;;  %v190_v63 = vld [vmem:[#allocation5 + $0x3f8] sm:$0xff]  ;;  %v926_v0 = vpack.c.bf16 %v140_v56, %v139_v55  ;;  %v928_v2 = vpack.c.bf16 %v158_v61, %v157_v60 }
  0x54   :  { %911 = vmatpush3.bf16.msra.mxu0 %v910_v10  ;;  %v958_v1 = vpack.c.bf16 %v172_v59, %v171_v57  ;;  %v141_v3 = vld [vmem:[#allocation5 + $0x270] sm:$0xff]  ;;  %v142_v4 = vld [vmem:[#allocation5 + $0x278] sm:$0xff]  ;;  %v960_v6 = vpack.c.bf16 %v190_v63, %v189_v62  ;;  %v207_v8 = vld [vmem:[#allocation5 + $0x480] sm:$0xff] }
  0x55   :  { %943 = vmatpush3.bf16.msra.mxu1 %v942_v14  ;;  %913 = vmatprep.subr.bf16.mxu0 %v912_v15  ;;  %v173_v5 = vld [vmem:[#allocation5 + $0x370] sm:$0xff]  ;;  %v174_v7 = vld [vmem:[#allocation5 + $0x378] sm:$0xff]  ;;  %v208_v9 = vld [vmem:[#allocation5 + $0x488] sm:$0xff]  ;;  %v930_v10 = vpack.c.bf16 %v142_v4, %v141_v3 }
  0x56   :  { %945 = vmatprep.subr.bf16.mxu1 %v944_v19  ;;  %v962_v11 = vpack.c.bf16 %v174_v7, %v173_v5  ;;  %v964_v12 = vpack.c.bf16 %v208_v9, %v207_v8  ;;  %v191_v13 = vld [vmem:[#allocation5 + $0x400] sm:$0xff]  ;;  %v192_v14 = vld [vmem:[#allocation5 + $0x408] sm:$0xff]  ;;  %v209_v15 = vld [vmem:[#allocation5 + $0x490] sm:$0xff] }
  0x57   :  { %v210_v16 = vld [vmem:[#allocation5 + $0x498] sm:$0xff]  ;;  %v47_v17 = vld [vmem:[#allocation2 + $0x20] sm:$0xff]  ;;  %v966_v18 = vpack.c.bf16 %v192_v14, %v191_v13  ;;  %v49_v19 = vld [vmem:[#allocation2 + $0x30] sm:$0xff] }
  0x58   :  { %915 = vmatpush3.bf16.msra.mxu0 %v914_v26  ;;  %v193_v20 = vld [vmem:[#allocation5 + $0x410] sm:$0xff]  ;;  %v194_v21 = vld [vmem:[#allocation5 + $0x418] sm:$0xff]  ;;  %v968_v23 = vpack.c.bf16 %v210_v16, %v209_v15  ;;  %v211_v24 = vld [vmem:[#allocation5 + $0x4a0] sm:$0xff] }
  0x59   :  { %947 = vmatpush3.bf16.msra.mxu1 %v946_v29  ;;  %917 = vmatprep.subr.bf16.mxu0 %v916_v30  ;;  %v58_v22 = vld [vmem:[#allocation2 + $0x78] sm:$0xff]  ;;  %v212_v25 = vld [vmem:[#allocation5 + $0x4a8] sm:$0xff]  ;;  %v57_v26 = vld [vmem:[#allocation2 + $0x70] sm:$0xff]  ;;  %v970_v28 = vpack.c.bf16 %v194_v21, %v193_v20 }
  0x5a   :  { %949 = vmatprep.subr.bf16.mxu1 %v948_v34  ;;  %v60_v27 = vld [vmem:[#allocation2 + $0x88] sm:$0xff]  ;;  %v59_v29 = vld [vmem:[#allocation2 + $0x80] sm:$0xff]  ;;  %v972_v30 = vpack.c.bf16 %v212_v25, %v211_v24  ;;  %v213_v33 = vld [vmem:[#allocation5 + $0x4b0] sm:$0xff] }
  0x5b   :  { %v195_v31 = vld [vmem:[#allocation5 + $0x420] sm:$0xff]  ;;  %v196_v32 = vld [vmem:[#allocation5 + $0x428] sm:$0xff]  ;;  %v214_v34 = vld [vmem:[#allocation5 + $0x4b8] sm:$0xff] }
  0x5c   :  { %919 = vmatpush3.bf16.msra.mxu0 %v918_v40  ;;  %v52_v35 = vld [vmem:[#allocation2 + $0x48] sm:$0xff]  ;;  %v974_v36 = vpack.c.bf16 %v196_v32, %v195_v31  ;;  %v62_v37 = vld [vmem:[#allocation2 + $0x98] sm:$0xff]  ;;  %v976_v38 = vpack.c.bf16 %v214_v34, %v213_v33  ;;  %v197_v39 = vld [vmem:[#allocation5 + $0x430] sm:$0xff] }
  0x5d   :  { %951 = vmatpush3.bf16.msra.mxu1 %v950_v41  ;;  %921 = vmatprep.subr.bf16.mxu0 %v920_v42  ;;  %v198_v40 = vld [vmem:[#allocation5 + $0x438] sm:$0xff]  ;;  %v215_v41 = vld [vmem:[#allocation5 + $0x4c0] sm:$0xff]  ;;  %v216_v42 = vld [vmem:[#allocation5 + $0x4c8] sm:$0xff] }
  0x5e   :  { %953 = vmatprep.subr.bf16.mxu1 %v952_v46  ;;  %v978_v43 = vpack.c.bf16 %v198_v40, %v197_v39  ;;  %v980_v44 = vpack.c.bf16 %v216_v42, %v215_v41  ;;  %v199_v45 = vld [vmem:[#allocation5 + $0x440] sm:$0xff]  ;;  %v200_v46 = vld [vmem:[#allocation5 + $0x448] sm:$0xff]  ;;  %v217_v47 = vld [vmem:[#allocation5 + $0x4d0] sm:$0xff] }
  0x5f   :  { %v218_v48 = vld [vmem:[#allocation5 + $0x4d8] sm:$0xff]  ;;  %v982_v49 = vpack.c.bf16 %v200_v46, %v199_v45  ;;  %v201_v51 = vld [vmem:[#allocation5 + $0x450] sm:$0xff]  ;;  %v203_v57 = vld [vmem:[#allocation5 + $0x460] sm:$0xff] }
  0x60   :  { %923 = vmatpush3.bf16.msra.mxu0 %v922_v52  ;;  %v984_v50 = vpack.c.bf16 %v218_v48, %v217_v47  ;;  %v202_v52 = vld [vmem:[#allocation5 + $0x458] sm:$0xff]  ;;  %v221_v59 = vld [vmem:[#allocation5 + $0x4f0] sm:$0xff]  ;;  %v645_v5 = vld [vmem:[%s1173_s2] ss:$0 sm:$0xff]  ;;  %s1105_s2 = smov [#allocation7]  }
  0x61   :  { %955 = vmatpush3.bf16.msra.mxu1 %v954_v53  ;;  %925 = vmatprep.subr.bf16.mxu0 %v924_v54  ;;  %v219_v53 = vld [vmem:[#allocation5 + $0x4e0] sm:$0xff]  ;;  %v220_v54 = vld [vmem:[#allocation5 + $0x4e8] sm:$0xff]  ;;  %v986_v55 = vpack.c.bf16 %v202_v52, %v201_v51  ;;  %v222_v60 = vld [vmem:[#allocation5 + $0x4f8] sm:$0xff]  ;;  %s632_s13 = sshll.u32 %s1105_s2, 4  ;;  %s633_s13 = int_to_ptr.vmem [resolvable:$true] %s632_s13 }
  0x62   :  { %957 = vmatprep.subr.bf16.mxu1 %v956_v58  ;;  %v988_v56 = vpack.c.bf16 %v220_v54, %v219_v53  ;;  %v204_v58 = vld [vmem:[#allocation5 + $0x468] sm:$0xff]  ;;  %v992_v62 = vpack.c.bf16 %v222_v60, %v221_v59  ;;  %v205_v63 = vld [vmem:[#allocation5 + $0x470] sm:$0xff]  ;;  %s1071_s14 = scalar_lea.vmem %s633_s13, 256  ;;  %p1076_p3 = scmp.lt.s32.totalorder %s633_s13, %s633_s13 }
  0x63   :  { %v990_v61 = vpack.c.bf16 %v204_v58, %v203_v57  ;;  %v61_v3 = vld [vmem:[#allocation2 + $0x90] sm:$0xff]  ;;  %p1072_p2 = scmp.ne.s32.totalorder %s633_s13, %s1071_s14  ;;  %p1077_p4 = scmp.lt.s32.totalorder %s1071_s14, %s1071_s14 }
  0x64   :  { %927 = vmatpush3.bf16.msra.mxu0 %v926_v0  ;;  %v206_v0 = vld [vmem:[#allocation5 + $0x478] sm:$0xff] }
  0x65   :  { %959 = vmatpush3.bf16.msra.mxu1 %v958_v1  ;;  %929 = vmatprep.subr.bf16.mxu0 %v928_v2  ;;  %v994_v1 = vpack.c.bf16 %v206_v0, %v205_v63  ;;  %v51_v2 = vld [vmem:[#allocation2 + $0x40] sm:$0xff]  ;;  %p1078_p5 = por %p1077_p4, %p1076_p3 }
  0x66   :  { %961 = vmatprep.subr.bf16.mxu1 %v960_v6 }
  0x67   :  { %p1079_p6 = pnand %p1078_p5, %p1072_p2 }
  0x68   :  { %931 = vmatpush3.bf16.msra.mxu0 %v930_v10 }
  0x69   :  { %963 = vmatpush3.bf16.msra.mxu1 %v962_v11  ;;  %965 = vmatprep.subr.bf16.mxu0 %v964_v12 }
  0x6a   :  { %996 = vmatprep.subr.bf16.mxu1 %v964_v12 }
  0x6b   :  { %445 = vmatmul.mubr.f32.vlgmr.msra.gmra.mrb[4].mxu0 %v47_v17 }
  0x6c   :  { %520 = vmatmul.mubr.f32.vlgmr.msra.gmra.mrb[4].mxu1 %v49_v19  ;;  %967 = vmatpush3.bf16.msra.mxu0 %v966_v18 }
  0x6d   :  { %1004 = vmatpush3.bf16.msra.mxu1 %v966_v18  ;;  %449 = vmatprep.mubr.f32.mxu0 %v58_v22 }
  0x6e   :  { %969 = vmatprep.subr.bf16.mxu0 %v968_v23  ;;  %997 = vmatprep.subr.bf16.mxu1 %v968_v23 }
  0x6f   :  { %450 = vmatmul.mubr.f32.gmra.mrb[6].mxu0 %v57_v26  ;;  %524 = vmatprep.mubr.f32.mxu1 %v60_v27 }
  0x70   :  { %971 = vmatpush3.bf16.msra.mxu0 %v970_v28  ;;  %525 = vmatmul.mubr.f32.gmra.mrb[6].mxu1 %v59_v29 }
  0x71   :  { %1005 = vmatpush3.bf16.msra.mxu1 %v970_v28  ;;  %973 = vmatprep.subr.bf16.mxu0 %v972_v30 }
  0x72   :  { %998 = vmatprep.subr.bf16.mxu1 %v972_v30  ;;  %594 = vmatprep.mubr.f32.mxu0 %v52_v35 }
  0x73   :  { %599 = vmatprep.mubr.f32.mxu1 %v62_v37 }
  0x74   :  { %975 = vmatpush3.bf16.msra.mxu0 %v974_v36 }
  0x75   :  { %1006 = vmatpush3.bf16.msra.mxu1 %v974_v36  ;;  %977 = vmatprep.subr.bf16.mxu0 %v976_v38 }
  0x76   :  { %999 = vmatprep.subr.bf16.mxu1 %v976_v38 }
  0x78   :  { %979 = vmatpush3.bf16.msra.mxu0 %v978_v43 }
  0x79   :  { %1007 = vmatpush3.bf16.msra.mxu1 %v978_v43  ;;  %981 = vmatprep.subr.bf16.mxu0 %v980_v44 }
  0x7a   :  { %1000 = vmatprep.subr.bf16.mxu1 %v980_v44 }
  0x7c   :  { %983 = vmatpush3.bf16.msra.mxu0 %v982_v49 }
  0x7d   :  { %1008 = vmatpush3.bf16.msra.mxu1 %v982_v49  ;;  %985 = vmatprep.subr.bf16.mxu0 %v984_v50 }
  0x7e   :  { %1001 = vmatprep.subr.bf16.mxu1 %v984_v50 }
  0x80   :  { %987 = vmatpush3.bf16.msra.mxu0 %v986_v55 }
  0x81   :  { %1009 = vmatpush3.bf16.msra.mxu1 %v986_v55  ;;  %989 = vmatprep.subr.bf16.mxu0 %v988_v56 }
  0x82   :  { %1002 = vmatprep.subr.bf16.mxu1 %v988_v56 }
  0x84   :  { %991 = vmatpush3.bf16.msra.mxu0 %v990_v61 }
  0x85   :  { %1010 = vmatpush3.bf16.msra.mxu1 %v990_v61  ;;  %993 = vmatprep.subr.bf16.mxu0 %v992_v62 }
  0x86   :  { %1003 = vmatprep.subr.bf16.mxu1 %v992_v62 }
  0x88   :  { %995 = vmatpush3.bf16.msra.mxu0 %v994_v1 }
  0x89   :  { %1011 = vmatpush3.bf16.msra.mxu1 %v994_v1 }
  0x8b   :  { %595 = vmatmul.mubr.f32.vlgmr.msra.gmra.mrb[8].mxu0 %v51_v2 }
  0x8c   :  { %600 = vmatmul.mubr.f32.vlgmr.msra.gmra.mrb[8].mxu1 %v61_v3 }
 0x11e   :  { %v678_v4 = vpop.f32.mrb[0].mxu0 }
 0x11f   :  { %v679_v6 = vpop.f32.mrb[1].mxu0  ;;  %v716_v7 = vpop.f32.mrb[0].mxu1 }
 0x120   :  { %v680_v8 = vadd.f32 %v679_v6, %v678_v4  ;;  %v717_v9 = vpop.f32.mrb[1].mxu1 }
 0x121   :  { %v718_v10 = vadd.f32 %v717_v9, %v716_v7 }
 0x122   :  { %v297_v11 = vadd.f32 %v680_v8, %v645_v5  ;;  %v681_v13 = vpop.f32.mrb[2].mxu0 }
 0x123   :  { %v682_v14 = vpop.f32.mrb[3].mxu0  ;;  %v719_v15 = vpop.f32.mrb[2].mxu1 }
 0x124   :  { %v372_v12 = vadd.f32 %v718_v10, %v297_v11  ;;  %v683_v16 = vadd.f32 %v682_v14, %v681_v13  ;;  %v720_v17 = vpop.f32.mrb[3].mxu1 }
 0x125   :  { %v721_v18 = vadd.f32 %v720_v17, %v719_v15 }
 0x126   :  { %v302_v19 = vadd.f32 %v683_v16, %v645_v5 }
 0x128   :  { %v377_v20 = vadd.f32 %v721_v18, %v302_v19 }
 0x13e   :  { %v754_v21 = vpop.f32.mrb[4].mxu0 }
 0x13f   :  { %v755_v22 = vpop.f32.mrb[5].mxu0  ;;  %v792_v23 = vpop.f32.mrb[4].mxu1 }
 0x140   :  { %v756_v24 = vadd.f32 %v755_v22, %v754_v21  ;;  %v793_v25 = vpop.f32.mrb[5].mxu1 }
 0x141   :  { %v794_v26 = vadd.f32 %v793_v25, %v792_v23 }
 0x142   :  { %v447_v27 = vadd.f32 %v756_v24, %v372_v12  ;;  %v757_v28 = vpop.f32.mrb[6].mxu0 }
 0x143   :  { %v758_v29 = vpop.f32.mrb[7].mxu0  ;;  %v795_v30 = vpop.f32.mrb[6].mxu1 }
 0x144   :  { %v522_v31 = vadd.f32 %v794_v26, %v447_v27  ;;  %v759_v32 = vadd.f32 %v758_v29, %v757_v28  ;;  %v796_v33 = vpop.f32.mrb[7].mxu1 }
 0x145   :  { %v797_v34 = vadd.f32 %v796_v33, %v795_v30 }
 0x146   :  { %v452_v35 = vadd.f32 %v759_v32, %v377_v20 }
 0x148   :  { %v527_v36 = vadd.f32 %v797_v34, %v452_v35 }
 0x15e   :  { %v830_v37 = vpop.f32.mrb[8].mxu0 }
 0x15f   :  { %v833_v38 = vpop.f32.mrb[8].mxu1  ;;  %v831_v39 = vpop.f32.mrb[9].mxu0 }
 0x160   :  { %v832_v40 = vadd.f32 %v831_v39, %v830_v37  ;;  %v834_v41 = vpop.f32.mrb[9].mxu1 }
 0x161   :  { %v835_v42 = vadd.f32 %v834_v41, %v833_v38 }
 0x162   :  { %v597_v43 = vadd.f32 %v832_v40, %v522_v31 }
 0x163   :  { %v602_v44 = vadd.f32 %v835_v42, %v527_v36 }
 0x164   :  { %605 = vmax.xlane.f32.xlu0 %v597_v43 }
 0x168   :  { %607 = vmax.xlane.f32.xlu0 %v602_v44 }
 0x1f1   :  { %v606_v45 = vpop.xlane.xlu0 %605 }
 0x1f2   :  { %v609_v46 = vsub.f32 %v597_v43, %v606_v45 }
 0x1f4   :  { %v611_v47 = vmul.f32 1.442695, %v609_v46 }
 0x1f5   :  { %v608_v48 = vpop.xlane.xlu0 %607 }
 0x1f6   :  { %v610_v49 = vsub.f32 %v602_v44, %v608_v48  ;;  %1019 = vpow2.f32 %v611_v47 }
 0x1f8   :  { %v613_v50 = vmul.f32 1.442695, %v610_v49 }
 0x1fa   :  { %1021 = vpow2.f32 %v613_v50 }
 0x200   :  { %v1020_v51 = vpop.eup %1019 }
 0x201   :  { %615 = vadd.xlane.f32.xlu1 %v1020_v51 }
 0x204   :  { %v1022_v52 = vpop.eup %1021 }
 0x205   :  { %617 = vadd.xlane.f32.xlu1 %v1022_v52 }
 0x28e   :  { %v616_v53 = vpop.xlane.xlu1 %615 }
 0x28f   :  { %1023 = vlog2.f32 %v616_v53 }
 0x292   :  { %v618_v54 = vpop.xlane.xlu1 %617 }
 0x293   :  { %1025 = vlog2.f32 %v618_v54 }
 0x299   :  { %v1024_v55 = vpop.eup %1023 }
 0x29a   :  { %v620_v56 = vmul.f32 0.6931472, %v1024_v55 }
 0x29c   :  { %v623_v57 = vsub.f32 %v609_v46, %v620_v56 }
 0x29d   :  { %v1026_v58 = vpop.eup %1025 }
 0x29e   :  { %625 = vst [vmem:[#allocation7] sm:$0xff] %v623_v57  ;;  %v622_v59 = vmul.f32 0.6931472, %v1026_v58 }
 0x2a0   :  { %v624_v60 = vsub.f32 %v610_v49, %v622_v59 }
 0x2a2   :  { %626 = vst [vmem:[#allocation7 + $0x8] sm:$0xff] %v624_v60 }
 0x2a3   :  { %1082 = shalt.err (!%p1079_p6)
}
 0x2a4   :  { %s1083_s17 = scalar_lea.hbm %s1174_s3, 256 }
 0x2a5   :  { %p1084_p7 = scmp.ne.s32.totalorder %s1174_s3, %s1083_s17  ;;  %p1087_p8 = scmp.lt.u32.totalorder %s1083_s17, %s1174_s3 }
 0x2a7   :  { %p1089_p9 = pnand %p1087_p8, %p1084_p7 }
 0x2a9   :  { %1092 = shalt.err (!%p1089_p9)
}
 0x2aa   :  { %638 = dma.vmem_to_hbm [thread:$0]  %s633_s13, 256, %s1174_s3, [#allocation4], %s1103_s0, %s1103_s0, %s1104_s9  }
 0x2ab   :  { %1097 = dma.done.wait [#allocation4], 256  }
 0x2ac   :  { %1098 = vsyncadd [#allocation4], 4294967040 }
 0x2ad   :  { %642 = vsyncpa [#allocation3], 1 }
 0x2ae   :  { %643 = vsyncpa [#allocation6], 1 }
 0x2af   :  { %644 = vsyncpa [#allocation4], 1 }

</bundles_post_ra>
